<compile_context>
chip_gen: v6e
topology: v6e:2x2x1
jax: 0.10.0
libtpu: 0.0.40
codegen_flags: <defaults>
</compile_context>

<pallas_src>
import jax
import jax.numpy as jnp
from jax.experimental import pallas as pl
from jax.experimental.pallas import tpu as pltpu


def embedding_kernel(x_ref, w1_ref, b1_ref, w2_ref, b2_ref, o_ref):
    # Fused: hidden = relu(x @ W1 + b1); out = hidden @ W2 + b2
    # x arrives f32 from HBM; bf16 cast happens here (VPU, hidden under MXU).
    x = x_ref[...].astype(jnp.bfloat16)                   # (TILE_M, IN_DIM)
    h = jnp.dot(x, w1_ref[...],
                preferred_element_type=jnp.float32)        # f32 MXU accumulate
    h = h + b1_ref[...]                                    # (1, HIDDEN) broadcast
    h = jnp.maximum(h, 0.0)
    e = jnp.dot(h.astype(jnp.bfloat16), w2_ref[...],
                preferred_element_type=jnp.float32)
    e = e + b2_ref[...]                                    # (1, EMB_P) broadcast
    o_ref[...] = e.astype(o_ref.dtype)                     # lane-dense bf16 store


def prepare_params(w1, b1, w2, b2):
    """One-time weight prep (cast/pad). Call at init, NOT per forward."""
    emb = w2.shape[1]
    emb_p = ((emb + 127) // 128) * 128                     # lane-dense output width
    w1_bf = jnp.asarray(w1, jnp.float32).astype(jnp.bfloat16)
    w2_bf = jnp.pad(jnp.asarray(w2, jnp.float32),
                    ((0, 0), (0, emb_p - emb))).astype(jnp.bfloat16)
    b1_f = jnp.asarray(b1, jnp.float32).reshape(1, -1)
    b2_f = jnp.pad(jnp.asarray(b2, jnp.float32).reshape(1, -1),
                   ((0, 0), (0, emb_p - emb)))
    return {"w1": w1_bf, "b1": b1_f, "w2": w2_bf, "b2": b2_f, "emb": emb}


def _choose_tile_m(n):
    if n < 8:
        return n                       # full-dim block (allowed when == array dim)
    # Aim for >= 4 grid steps so v7x's two TCs each get >= 2 tiles, but cap
    # tiles at 256 rows (big enough to amortize ~0.35us/step on v5e/v6e).
    tm = -(-n // 4)                    # ceil(n / 4)
    tm = ((tm + 7) // 8) * 8           # sublane align
    return max(8, min(256, tm))


def net_forward(i1, params):
    """Pallas equivalent of Net.forward: returns embeddingNet(i1) as f32."""
    w1, b1, w2, b2 = params["w1"], params["b1"], params["w2"], params["b2"]
    emb = params["emb"]

    n = i1.shape[0]
    x = i1.reshape(n, -1)              # stays f32; cast to bf16 inside the kernel
    in_dim = x.shape[1]
    hidden = w1.shape[1]
    emb_p = w2.shape[1]

    tile_m = _choose_tile_m(n)
    grid = (pl.cdiv(n, tile_m),)       # ragged last tile: OOB reads are garbage
                                       # rows (row-independent math), OOB writes dropped
    vmem = pltpu.MemorySpace.VMEM

    # Actual VMEM need: x/out double-buffered, weights/biases single-buffered.
    vmem_need = (
        2 * tile_m * in_dim * 4        # x blocks (f32, 2 bufs)
        + in_dim * hidden * 2          # W1 (bf16, resident, 1 buf)
        + hidden * emb_p * 2           # W2 (bf16, resident, 1 buf)
        + (hidden + emb_p) * 4         # biases (f32)
        + 2 * tile_m * emb_p * 2       # out blocks (bf16, 2 bufs)
        + tile_m * (hidden + emb_p) * 4  # in-kernel f32 intermediates
    )
    vmem_limit = int(min(max(2 * vmem_need, 16 * 1024 * 1024), 48 * 1024 * 1024))

    flops = 2 * n * (in_dim * hidden + hidden * emb_p)
    bytes_accessed = (
        n * in_dim * 4                 # x (f32, read once)
        + in_dim * hidden * 2          # W1 (bf16)
        + hidden * emb_p * 2           # W2 (bf16)
        + (hidden + emb_p) * 4         # biases (f32)
        + n * emb_p * 2                # output (bf16)
    )

    out = pl.pallas_call(
        embedding_kernel,
        out_shape=jax.ShapeDtypeStruct((n, emb_p), jnp.bfloat16),
        grid=grid,
        in_specs=[
            pl.BlockSpec((tile_m, in_dim), lambda i: (i, 0), memory_space=vmem),
            # Weights/biases: constant index_map -> DMA'd once, VMEM-resident
            # across the parallel batch grid; single-buffered to halve their
            # VMEM footprint (matters under v7x's 64 MiB).
            pl.BlockSpec((in_dim, hidden), lambda i: (0, 0), memory_space=vmem,
                         pipeline_mode=pl.Buffered(1)),
            pl.BlockSpec((1, hidden), lambda i: (0, 0), memory_space=vmem,
                         pipeline_mode=pl.Buffered(1)),
            pl.BlockSpec((hidden, emb_p), lambda i: (0, 0), memory_space=vmem,
                         pipeline_mode=pl.Buffered(1)),
            pl.BlockSpec((1, emb_p), lambda i: (0, 0), memory_space=vmem,
                         pipeline_mode=pl.Buffered(1)),
        ],
        out_specs=pl.BlockSpec((tile_m, emb_p), lambda i: (i, 0),
                               memory_space=vmem),
        compiler_params=pltpu.CompilerParams(
            dimension_semantics=("parallel",),   # v7x: 2 TCs split the row tiles
            vmem_limit_bytes=vmem_limit,
        ),
        cost_estimate=pl.CostEstimate(
            flops=int(flops), transcendentals=0,
            bytes_accessed=int(bytes_accessed)),
    )(x, w1, b1, w2, b2)

    # Slice off the lane padding and upcast the bf16 embedding to f32.
    return out[:, :emb].astype(jnp.float32)


def reference_forward_bf16(i1, w1, b1, w2, b2):
    # Same bf16-weight / bf16-activation / f32-accumulate contract as the kernel.
    x = i1.reshape(i1.shape[0], -1).astype(jnp.bfloat16)
    h = jnp.dot(x, w1.astype(jnp.bfloat16),
                preferred_element_type=jnp.float32) + b1.reshape(1, -1)
    h = jnp.maximum(h, 0.0)
    e = jnp.dot(h.astype(jnp.bfloat16), w2.astype(jnp.bfloat16),
                preferred_element_type=jnp.float32) + b2.reshape(1, -1)
    return e


def reference_forward_f32(i1, w1, b1, w2, b2):
    # Pure f32 reference (what the PyTorch module computes). The kernel's
    # bf16 weight/activation/output path is an intentional precision trade
    # (f32 MXU accumulation preserved via preferred_element_type).
    x = i1.reshape(i1.shape[0], -1)
    h = jnp.maximum(x @ w1 + b1.reshape(1, -1), 0.0)
    return h @ w2 + b2.reshape(1, -1)


if __name__ == "__main__":
    # Small shapes consistent with an image-embedding forward pass.
    N, C, H, W = 2, 4, 16, 16
    IN_DIM = C * H * W            # 1024
    HIDDEN = 128
    EMB = 32

    key = jax.random.PRNGKey(0)
    k_x, k_w1, k_b1, k_w2, k_b2 = jax.random.split(key, 5)

    i1 = jax.random.normal(k_x, (N, C, H, W), dtype=jnp.float32)
    w1 = jax.random.normal(k_w1, (IN_DIM, HIDDEN), dtype=jnp.float32) * 0.02
    b1 = jax.random.normal(k_b1, (1, HIDDEN), dtype=jnp.float32) * 0.01
    w2 = jax.random.normal(k_w2, (HIDDEN, EMB), dtype=jnp.float32) * 0.02
    b2 = jax.random.normal(k_b2, (1, EMB), dtype=jnp.float32) * 0.01

    # One-time weight prep (hoisted out of the per-forward path).
    params = prepare_params(w1, b1, w2, b2)

    e1 = net_forward(i1, params)
    jax.block_until_ready(e1)
    assert e1.shape == (N, EMB)

    # Check against the bf16-matched reference (tight tolerance) ...
    ref_bf16 = reference_forward_bf16(i1, w1, b1, w2, b2)
    assert jnp.allclose(e1, ref_bf16, atol=2e-2, rtol=2e-2), "mismatch vs bf16 reference"

    # ... and against the pure-f32 reference (covers the intentional bf16 trade).
    ref_f32 = reference_forward_f32(i1, w1, b1, w2, b2)
    assert jnp.allclose(e1, ref_f32, atol=5e-2, rtol=5e-2), "mismatch vs f32 reference"

    print("KERNEL_OK")
</pallas_src>

<mosaic_0001>
module attributes {stable_mosaic.version = 11 : i64} {
  func.func @embedding_kernel(%arg0: i32, %arg1: memref<2x1024xf32, #tpu.memory_space<vmem>>, %arg2: memref<1024x128xbf16, #tpu.memory_space<vmem>>, %arg3: memref<1x128xf32, #tpu.memory_space<vmem>>, %arg4: memref<128x128xbf16, #tpu.memory_space<vmem>>, %arg5: memref<1x128xf32, #tpu.memory_space<vmem>>, %arg6: memref<2x128xbf16, #tpu.memory_space<vmem>>) attributes {dimension_semantics = [#tpu.dimension_semantics<parallel>], iteration_bounds = array<i64: 1>, scalar_prefetch = 0 : i64, scratch_operands = 0 : i64, tpu.core_type = #tpu.core_type<tc>, window_params = [{transform_indices = @transform_0, window_bounds = array<i64: 2, 1024>}, {pipeline_mode = #tpu.pipeline_mode<synchronous>, transform_indices = @transform_1, window_bounds = array<i64: 1024, 128>}, {pipeline_mode = #tpu.pipeline_mode<synchronous>, transform_indices = @transform_2, window_bounds = array<i64: 1, 128>}, {pipeline_mode = #tpu.pipeline_mode<synchronous>, transform_indices = @transform_3, window_bounds = array<i64: 128, 128>}, {pipeline_mode = #tpu.pipeline_mode<synchronous>, transform_indices = @transform_4, window_bounds = array<i64: 1, 128>}, {transform_indices = @transform_5, window_bounds = array<i64: 2, 128>}]} {
    %c0 = arith.constant 0 : index
    %c0_0 = arith.constant 0 : index
    %0 = vector.load %arg1[%c0, %c0_0] : memref<2x1024xf32, #tpu.memory_space<vmem>>, vector<2x1024xf32>
    %1 = arith.truncf %0 : vector<2x1024xf32> to vector<2x1024xbf16>
    %c0_1 = arith.constant 0 : index
    %c0_2 = arith.constant 0 : index
    %2 = vector.load %arg2[%c0_1, %c0_2] : memref<1024x128xbf16, #tpu.memory_space<vmem>>, vector<1024x128xbf16>
    %cst = arith.constant dense<0.000000e+00> : vector<2x128xf32>
    %3 = tpu.matmul %1, %2, %cst {dimension_numbers = #tpu.dot_dimension_numbers<[1], [0], [0], [1], [0, 0, 1, 1], [], []>} : vector<2x1024xbf16>, vector<1024x128xbf16>, vector<2x128xf32> -> vector<2x128xf32>
    %c0_3 = arith.constant 0 : index
    %c0_4 = arith.constant 0 : index
    %4 = vector.load %arg3[%c0_3, %c0_4] : memref<1x128xf32, #tpu.memory_space<vmem>>, vector<1x128xf32>
    %5 = vector.broadcast %4 : vector<1x128xf32> to vector<2x128xf32>
    %6 = arith.addf %3, %5 : vector<2x128xf32>
    %cst_5 = arith.constant 0.000000e+00 : f32
    %7 = vector.broadcast %cst_5 : f32 to vector<2x128xf32>
    %8 = arith.maximumf %6, %7 : vector<2x128xf32>
    %9 = arith.truncf %8 : vector<2x128xf32> to vector<2x128xbf16>
    %c0_6 = arith.constant 0 : index
    %c0_7 = arith.constant 0 : index
    %10 = vector.load %arg4[%c0_6, %c0_7] : memref<128x128xbf16, #tpu.memory_space<vmem>>, vector<128x128xbf16>
    %cst_8 = arith.constant dense<0.000000e+00> : vector<2x128xf32>
    %11 = tpu.matmul %9, %10, %cst_8 {dimension_numbers = #tpu.dot_dimension_numbers<[1], [0], [0], [1], [0, 0, 1, 1], [], []>} : vector<2x128xbf16>, vector<128x128xbf16>, vector<2x128xf32> -> vector<2x128xf32>
    %c0_9 = arith.constant 0 : index
    %c0_10 = arith.constant 0 : index
    %12 = vector.load %arg5[%c0_9, %c0_10] : memref<1x128xf32, #tpu.memory_space<vmem>>, vector<1x128xf32>
    %13 = vector.broadcast %12 : vector<1x128xf32> to vector<2x128xf32>
    %14 = arith.addf %11, %13 : vector<2x128xf32>
    %15 = arith.truncf %14 : vector<2x128xf32> to vector<2x128xbf16>
    %c0_11 = arith.constant 0 : index
    %c0_12 = arith.constant 0 : index
    %16 = vector.load %arg6[%c0_11, %c0_12] : memref<2x128xbf16, #tpu.memory_space<vmem>>, vector<2x128xbf16>
    tpu.vector_store %arg6[%c0_11, %c0_12], %15 {strides = array<i32>} : memref<2x128xbf16, #tpu.memory_space<vmem>>, vector<2x128xbf16>,
    return
  }
  func.func @transform_0(%arg0: i32) -> (i32, i32) {
    %c0_i32 = arith.constant 0 : i32
    %c0_i32_0 = arith.constant 0 : i32
    return %arg0, %c0_i32 : i32, i32
  }
  func.func @transform_1(%arg0: i32) -> (i32, i32) {
    %c0_i32 = arith.constant 0 : i32
    %c0_i32_0 = arith.constant 0 : i32
    %c0_i32_1 = arith.constant 0 : i32
    return %c0_i32, %c0_i32_0 : i32, i32
  }
  func.func @transform_2(%arg0: i32) -> (i32, i32) {
    %c0_i32 = arith.constant 0 : i32
    %c0_i32_0 = arith.constant 0 : i32
    %c0_i32_1 = arith.constant 0 : i32
    return %c0_i32, %c0_i32_0 : i32, i32
  }
  func.func @transform_3(%arg0: i32) -> (i32, i32) {
    %c0_i32 = arith.constant 0 : i32
    %c0_i32_0 = arith.constant 0 : i32
    %c0_i32_1 = arith.constant 0 : i32
    return %c0_i32, %c0_i32_0 : i32, i32
  }
  func.func @transform_4(%arg0: i32) -> (i32, i32) {
    %c0_i32 = arith.constant 0 : i32
    %c0_i32_0 = arith.constant 0 : i32
    %c0_i32_1 = arith.constant 0 : i32
    return %c0_i32, %c0_i32_0 : i32, i32
  }
  func.func @transform_5(%arg0: i32) -> (i32, i32) {
    %c0_i32 = arith.constant 0 : i32
    %c0_i32_0 = arith.constant 0 : i32
    return %arg0, %c0_i32 : i32, i32
  }
}

</mosaic_0001>

<bundles_post_ra>
// kernel: tpu_custom_call.1
= control target key start
LH: loop header
LB: loop body
LE: loop exit
PB: predicated region body
PF: predicated region fallthrough
CT: control target
= control target key end

     0   :  { %10 = vsyncpa [#allocation3], 0  ;;  %s1348_s0 = inlined_call_operand.hbm [shape: f32[2,1024], index: 0, kind: input, shape index: {}]   ;;  %s1349_s1 = inlined_call_operand.hbm [shape: bf16[1024,128], index: 1, kind: input, shape index: {}]   ;;  %s1350_s2 = inlined_call_operand.vmem [shape: f32[1,128], index: 2, kind: input, shape index: {}]   ;;  %s1351_s3 = inlined_call_operand.hbm [shape: bf16[128,128], index: 3, kind: input, shape index: {}]   ;;  %s1352_s4 = inlined_call_operand.vmem [shape: f32[1,128], index: 4, kind: input, shape index: {}]   ;;  %s1353_s5 = inlined_call_operand.hbm [shape: bf16[2,128], index: 5, kind: output, shape index: {}]  }
   0x1   :  { %11 = vsyncpa [#allocation6], 0 }
   0x2   :  { %12 = vsyncpa [#allocation4], 0  ;;  %s1285_s18 = smov [#allocation5]  }
   0x3   :  { %s28_s19 = sshll.u32 %s1285_s18, 4  ;;  %s29_s19 = int_to_ptr.vmem [resolvable:$true] %s28_s19 }
   0x4   :  { %s1207_s20 = scalar_lea.vmem %s29_s19, 8192  ;;  %p1212_p1 = scmp.lt.s32.totalorder %s29_s19, %s29_s19 }
   0x5   :  { %p1208_p0 = scmp.ne.s32.totalorder %s29_s19, %s1207_s20  ;;  %p1213_p2 = scmp.lt.s32.totalorder %s1207_s20, %s1207_s20 }
   0x7   :  { %p1214_p3 = por %p1213_p2, %p1212_p1 }
   0x9   :  { %p1215_p4 = pnand %p1214_p3, %p1208_p0 }
   0xb   :  { %1218 = shalt.err (!%p1215_p4)
}
   0xc   :  { %s1286_s21 = smov 64   ;;  %s1287_s22 = smov 4  }
   0xd   :  { %34 = dma.hbm_to_vmem [thread:$0]  %s1349_s1, 8192, %s29_s19, [#allocation6], %s1286_s21, %s1286_s21, %s1287_s22  }
   0xe   :  { %s1288_s25 = smov [#allocation2]   ;;  %s1289_s27 = smov [#allocation7]  }
   0xf   :  { %s19_s26 = sshll.u32 %s1288_s25, 4  ;;  %s42_s28 = sshll.u32 %s1289_s27, 4  ;;  %s20_s26 = int_to_ptr.vmem [resolvable:$true] %s19_s26  ;;  %s43_s28 = int_to_ptr.vmem [resolvable:$true] %s42_s28 }
  0x10   :  { %s1227_s29 = scalar_lea.vmem %s20_s26, 256  ;;  %p1232_p6 = scmp.lt.s32.totalorder %s20_s26, %s20_s26 }
  0x11   :  { %p1228_p5 = scmp.ne.s32.totalorder %s20_s26, %s1227_s29  ;;  %p1233_p7 = scmp.lt.s32.totalorder %s1227_s29, %s1227_s29 }
  0x13   :  { %p1234_p8 = por %p1233_p7, %p1232_p6 }
  0x15   :  { %p1235_p9 = pnand %p1234_p8, %p1228_p5 }
  0x17   :  { %1238 = shalt.err (!%p1235_p9)
}
  0x18   :  { %22 = dma.hbm_to_vmem [thread:$0]  %s1348_s0, 256, %s20_s26, [#allocation3]  }
  0x19   :  { %s1247_s7 = scalar_lea.vmem %s43_s28, 1024  ;;  %p1252_p11 = scmp.lt.s32.totalorder %s43_s28, %s43_s28 }
  0x1a   :  { %p1248_p10 = scmp.ne.s32.totalorder %s43_s28, %s1247_s7  ;;  %p1253_p12 = scmp.lt.s32.totalorder %s1247_s7, %s1247_s7 }
  0x1c   :  { %p1254_p13 = por %p1253_p12, %p1252_p11 }
  0x1e   :  { %p1255_p0 = pnand %p1254_p13, %p1248_p10 }
  0x20   :  { %1258 = shalt.err (!%p1255_p0)
}
  0x21   :  { %48 = dma.hbm_to_vmem [thread:$0]  %s1351_s3, 1024, %s43_s28, [#allocation6], %s1286_s21, %s1286_s21, %s1287_s22  }
  0x22   :  { %1279 = dma.done.wait [#allocation3], 256  }
  0x23   :  { %1280 = vsyncadd [#allocation3], 4294967040 }
  0x24   :  { %1281 = dma.done.wait [#allocation6], 9216  }
  0x25   :  { %1282 = vsyncadd [#allocation6], 4294958080  ;;  %v1125_v0 = vld [vmem:[#allocation5 + $0x78] sm:$0xff]   ;;  %v1129_v4 = vld [vmem:[#allocation5 + $0x70] sm:$0xff]   ;;  %v1290_v22 = vmov 1983009808   ;;  %v69_v24 = vlaneseq }
  0x26   :  { %v1126_v1 = vld [vmem:[#allocation5 + $0xf8] sm:$0xff]   ;;  %999 = vmatprep.subr.bf16.mxu0 %v1125_v0  ;;  %v1130_v5 = vld [vmem:[#allocation5 + $0xf0] sm:$0xff]   ;;  %v1133_v8 = vld [vmem:[#allocation5 + $0x68] sm:$0xff]   ;;  %v67_v23 = vunpack.c.l.s4 %v1290_v22  ;;  %vm1292_vm0 = vmmov 0   ;;  %s1293_s10 = smov [#allocation8]  }
  0x27   :  { %v1127_v2 = vld [vmem:[#allocation5 + $0x38] sm:$0xff]   ;;  %1021 = vmatprep.subr.bf16.mxu1 %v1126_v1  ;;  %v1131_v6 = vld [vmem:[#allocation5 + $0x30] sm:$0xff]   ;;  %v1134_v9 = vld [vmem:[#allocation5 + $0xe8] sm:$0xff]   ;;  %v70_v30 = vshrl.u32 %v69_v24, 7  ;;  %s915_s11 = sshll.u32 %s1293_s10, 4  ;;  %s916_s11 = int_to_ptr.vmem [resolvable:$true] %s915_s11 }
  0x28   :  { %v1128_v3 = vld [vmem:[#allocation5 + $0xb8] sm:$0xff]   ;;  %1000 = vmatpush3.bf16.msra.mxu0 %v1127_v2  ;;  %v1132_v7 = vld [vmem:[#allocation5 + $0xb0] sm:$0xff]   ;;  %v1135_v10 = vld [vmem:[#allocation5 + $0x28] sm:$0xff]   ;;  %v68_v29 = vunpack.c.0.s8 %v67_v23  ;;  %s1259_s12 = scalar_lea.vmem %s916_s11, 16  ;;  %s1263_s13 = scalar_lea.vmem %s916_s11, 32 }
  0x29   :  { %1022 = vmatpush3.bf16.msra.mxu1 %v1128_v3  ;;  %1001 = vmatprep.subr.bf16.mxu0 %v1129_v4  ;;  %v1136_v11 = vld [vmem:[#allocation5 + $0xa8] sm:$0xff]   ;;  %v1137_v12 = vld [vmem:[#allocation5 + $0x60] sm:$0xff]   ;;  %v1141_v16 = vld [vmem:[#allocation5 + $0x58] sm:$0xff]   ;;  %p1260_p1 = scmp.ne.s32.totalorder %s916_s11, %s1259_s12  ;;  %p1264_p2 = scmp.lt.s32.totalorder %s916_s11, %s916_s11 }
  0x2a   :  { %1023 = vmatprep.subr.bf16.mxu1 %v1130_v5  ;;  %v1138_v13 = vld [vmem:[#allocation5 + $0xe0] sm:$0xff]   ;;  %v1142_v17 = vld [vmem:[#allocation5 + $0xd8] sm:$0xff]   ;;  %v1145_v20 = vld [vmem:[#allocation5 + $0x50] sm:$0xff]   ;;  %v1333_v35 = vsub.s32 %v68_v29, %v70_v30  ;;  %p1265_p3 = scmp.lt.s32.totalorder %s1263_s13, %s1259_s12 }
  0x2b   :  { %v1139_v14 = vld [vmem:[#allocation5 + $0x20] sm:$0xff]   ;;  %v1143_v18 = vld [vmem:[#allocation5 + $0x18] sm:$0xff]   ;;  %v1146_v21 = vld [vmem:[#allocation5 + $0xd0] sm:$0xff]  }
  0x2c   :  { %1002 = vmatpush3.bf16.msra.mxu0 %v1131_v6  ;;  %v1140_v15 = vld [vmem:[#allocation5 + $0xa0] sm:$0xff]   ;;  %v1144_v19 = vld [vmem:[#allocation5 + $0x98] sm:$0xff]   ;;  %v1147_v25 = vld [vmem:[#allocation5 + $0x10] sm:$0xff]   ;;  %p1266_p4 = por %p1265_p3, %p1264_p2 }
  0x2d   :  { %1024 = vmatpush3.bf16.msra.mxu1 %v1132_v7  ;;  %1003 = vmatprep.subr.bf16.mxu0 %v1133_v8  ;;  %v1148_v26 = vld [vmem:[#allocation5 + $0x90] sm:$0xff]   ;;  %v1149_v27 = vld [vmem:[#allocation5 + $0x48] sm:$0xff]   ;;  %v1153_v33 = vld [vmem:[#allocation5 + $0x40] sm:$0xff]  }
  0x2e   :  { %1025 = vmatprep.subr.bf16.mxu1 %v1134_v9  ;;  %v1150_v28 = vld [vmem:[#allocation5 + $0xc8] sm:$0xff]   ;;  %v1154_v34 = vld [vmem:[#allocation5 + $0xc0] sm:$0xff]   ;;  %v61_v38 = vld [vmem:[#allocation2] sm:$0xff]  ;;  %p1267_p5 = pnand %p1266_p4, %p1260_p1 }
  0x2f   :  { %v1151_v31 = vld [vmem:[#allocation5 + $0x8] sm:$0xff]   ;;  %v1155_v36 = vld [vmem:[#allocation5] sm:$0xff]   ;;  %v72_v39 = vrot.slane %v61_v38, %v1333_v35  ;;  %v65_v40 = vcombine.high %v61_v38, %v61_v38  ;;  %v1158_v41 = vld [vmem:[#allocation5 + $0x178] sm:$0xff]  }
  0x30   :  { %1004 = vmatpush3.bf16.msra.mxu0 %v1135_v10  ;;  %v1152_v32 = vld [vmem:[#allocation5 + $0x88] sm:$0xff]   ;;  %v1156_v37 = vld [vmem:[#allocation5 + $0x80] sm:$0xff]   ;;  %v1159_v42 = vld [vmem:[#allocation5 + $0x1f8] sm:$0xff]  }
  0x31   :  { %1026 = vmatpush3.bf16.msra.mxu1 %v1136_v11  ;;  %1005 = vmatprep.subr.bf16.mxu0 %v1137_v12  ;;  %v80_v43 = vcombine.high %v72_v39, %v72_v39  ;;  %v79_v44 = vrot.slane %v65_v40, %v1333_v35  ;;  %v107_v45 = vpack.c.bf16 %v72_v39, %v72_v39  ;;  %v1160_v46 = vld [vmem:[#allocation5 + $0x138] sm:$0xff]   ;;  %v1162_v51 = vld [vmem:[#allocation5 + $0x170] sm:$0xff]   ;;  %v1166_v56 = vld [vmem:[#allocation5 + $0x168] sm:$0xff]  }
  0x32   :  { %1027 = vmatprep.subr.bf16.mxu1 %v1138_v13  ;;  %v1161_v49 = vld [vmem:[#allocation5 + $0x1b8] sm:$0xff]   ;;  %v1163_v53 = vld [vmem:[#allocation5 + $0x1f0] sm:$0xff]   ;;  %v1167_v57 = vld [vmem:[#allocation5 + $0x1e8] sm:$0xff]  }
  0x33   :  { %v108_v47 = vpack.c.bf16 %v80_v43, %v80_v43  ;;  %v81_v48 = vcombine.high %v79_v44, %v79_v44  ;;  %v109_v50 = vpack.c.bf16 %v79_v44, %v79_v44  ;;  %v1164_v54 = vld [vmem:[#allocation5 + $0x130] sm:$0xff]   ;;  %v1168_v58 = vld [vmem:[#allocation5 + $0x128] sm:$0xff]   ;;  %v1170_v60 = vld [vmem:[#allocation5 + $0x160] sm:$0xff]  }
  0x34   :  { %1006 = vmatpush3.bf16.msra.mxu0 %v1139_v14  ;;  %v1165_v55 = vld [vmem:[#allocation5 + $0x1b0] sm:$0xff]   ;;  %v1169_v59 = vld [vmem:[#allocation5 + $0x1a8] sm:$0xff]   ;;  %v1171_v61 = vld [vmem:[#allocation5 + $0x1e0] sm:$0xff]  }
  0x35   :  { %1028 = vmatpush3.bf16.msra.mxu1 %v1140_v15  ;;  %1007 = vmatprep.subr.bf16.mxu0 %v1141_v16  ;;  %v110_v52 = vpack.c.bf16 %v81_v48, %v81_v48  ;;  %v1172_v62 = vld [vmem:[#allocation5 + $0x120] sm:$0xff]   ;;  %v1174_v0 = vld [vmem:[#allocation5 + $0x158] sm:$0xff]   ;;  %v1178_v4 = vld [vmem:[#allocation5 + $0x150] sm:$0xff]  }
  0x36   :  { %1029 = vmatprep.subr.bf16.mxu1 %v1142_v17  ;;  %666 = vmatprep.mubr.bf16.mxu0 %v108_v47  ;;  %v1173_v63 = vld [vmem:[#allocation5 + $0x1a0] sm:$0xff]   ;;  %v1175_v1 = vld [vmem:[#allocation5 + $0x1d8] sm:$0xff]   ;;  %v1179_v5 = vld [vmem:[#allocation5 + $0x1d0] sm:$0xff]  }
  0x37   :  { %706 = vmatprep.mubr.bf16.mxu1 %v110_v52  ;;  %v1176_v2 = vld [vmem:[#allocation5 + $0x118] sm:$0xff]   ;;  %v1180_v6 = vld [vmem:[#allocation5 + $0x110] sm:$0xff]   ;;  %v1182_v8 = vld [vmem:[#allocation5 + $0x148] sm:$0xff]  }
  0x38   :  { %1008 = vmatpush3.bf16.msra.mxu0 %v1143_v18  ;;  %v1177_v3 = vld [vmem:[#allocation5 + $0x198] sm:$0xff]   ;;  %v1181_v7 = vld [vmem:[#allocation5 + $0x190] sm:$0xff]   ;;  %v1183_v9 = vld [vmem:[#allocation5 + $0x1c8] sm:$0xff]  }
  0x39   :  { %1030 = vmatpush3.bf16.msra.mxu1 %v1144_v19  ;;  %1009 = vmatprep.subr.bf16.mxu0 %v1145_v20  ;;  %v1184_v10 = vld [vmem:[#allocation5 + $0x108] sm:$0xff]   ;;  %v1186_v12 = vld [vmem:[#allocation5 + $0x140] sm:$0xff]   ;;  %v62_v15 = vld [vmem:[#allocation2 + $0x8] sm:$0xff] }
  0x3a   :  { %1031 = vmatprep.subr.bf16.mxu1 %v1146_v21  ;;  %v1185_v11 = vld [vmem:[#allocation5 + $0x188] sm:$0xff]   ;;  %v1187_v13 = vld [vmem:[#allocation5 + $0x1c0] sm:$0xff]   ;;  %v89_v17 = vrot.slane %v62_v15, %v1333_v35  ;;  %v82_v18 = vcombine.high %v62_v15, %v62_v15  ;;  %v925_v44 = vld [vmem:[%s1350_s2] ss:$0 sm:$0xff] }
  0x3b   :  { %v1188_v14 = vld [vmem:[#allocation5 + $0x100] sm:$0xff]   ;;  %v1193_v29 = vld [vmem:[#allocation7 + $0x28] sm:$0xff]  }
  0x3c   :  { %1010 = vmatpush3.bf16.msra.mxu0 %v1147_v25  ;;  %v1189_v16 = vld [vmem:[#allocation5 + $0x180] sm:$0xff]   ;;  %v97_v19 = vcombine.high %v89_v17, %v89_v17  ;;  %v96_v20 = vrot.slane %v82_v18, %v1333_v35  ;;  %v111_v21 = vpack.c.bf16 %v89_v17, %v89_v17 }
  0x3d   :  { %1032 = vmatpush3.bf16.msra.mxu1 %v1148_v26  ;;  %1011 = vmatprep.subr.bf16.mxu0 %v1149_v27  ;;  %v1191_v26 = vld [vmem:[#allocation7 + $0x38] sm:$0xff]   ;;  %v1291_v27 = vmov 0.0   ;;  %v1194_v30 = vld [vmem:[#allocation7 + $0x20] sm:$0xff]  }
  0x3e   :  { %1033 = vmatprep.subr.bf16.mxu1 %v1150_v28  ;;  %v112_v22 = vpack.c.bf16 %v97_v19, %v97_v19  ;;  %v98_v23 = vcombine.high %v96_v20, %v96_v20  ;;  %v113_v24 = vpack.c.bf16 %v96_v20, %v96_v20  ;;  %v1192_v28 = vld [vmem:[#allocation7 + $0x30] sm:$0xff]  }
  0x40   :  { %1012 = vmatpush3.bf16.msra.mxu0 %v1151_v31  ;;  %v114_v25 = vpack.c.bf16 %v98_v23, %v98_v23  ;;  %v1195_v31 = vld [vmem:[#allocation7 + $0x18] sm:$0xff]  }
  0x41   :  { %1034 = vmatpush3.bf16.msra.mxu1 %v1152_v32  ;;  %1013 = vmatprep.subr.bf16.mxu0 %v1153_v33  ;;  %v1196_v32 = vld [vmem:[#allocation7 + $0x10] sm:$0xff]   ;;  %v1197_v33 = vld [vmem:[#allocation7 + $0x8] sm:$0xff]  }
  0x42   :  { %1035 = vmatprep.subr.bf16.mxu1 %v1154_v34  ;;  %v1198_v34 = vld [vmem:[#allocation7] sm:$0xff]  }
  0x44   :  { %1014 = vmatpush3.bf16.msra.mxu0 %v1155_v36 }
  0x45   :  { %1036 = vmatpush3.bf16.msra.mxu1 %v1156_v37  ;;  %1043 = vmatprep.subr.bf16.mxu0 %v1158_v41 }
  0x46   :  { %1065 = vmatprep.subr.bf16.mxu1 %v1159_v42 }
  0x47   :  { %667 = vmatmul.mubr.bf16.vlgmr.msra.gmra.mxu0 %v107_v45 }
  0x48   :  { %1044 = vmatpush3.bf16.msra.mxu0 %v1160_v46  ;;  %707 = vmatmul.mubr.bf16.vlgmr.msra.gmra.mxu1 %v109_v50 }
  0x49   :  { %1045 = vmatprep.subr.bf16.mxu0 %v1162_v51  ;;  %1066 = vmatpush3.bf16.msra.mxu1 %v1161_v49 }
  0x4a   :  { %1067 = vmatprep.subr.bf16.mxu1 %v1163_v53  ;;  %746 = vmatprep.mubr.bf16.mxu0 %v112_v22 }
  0x4b   :  { %786 = vmatprep.mubr.bf16.mxu1 %v114_v25 }
  0x4c   :  { %1046 = vmatpush3.bf16.msra.mxu0 %v1164_v54 }
  0x4d   :  { %1047 = vmatprep.subr.bf16.mxu0 %v1166_v56  ;;  %1068 = vmatpush3.bf16.msra.mxu1 %v1165_v55 }
  0x4e   :  { %1069 = vmatprep.subr.bf16.mxu1 %v1167_v57 }
  0x50   :  { %1048 = vmatpush3.bf16.msra.mxu0 %v1168_v58 }
  0x51   :  { %1049 = vmatprep.subr.bf16.mxu0 %v1170_v60  ;;  %1070 = vmatpush3.bf16.msra.mxu1 %v1169_v59 }
  0x52   :  { %1071 = vmatprep.subr.bf16.mxu1 %v1171_v61 }
  0x54   :  { %1050 = vmatpush3.bf16.msra.mxu0 %v1172_v62  ;;  %v990_v62 = vld [vmem:[%s1352_s4] ss:$0 sm:$0xff] }
  0x55   :  { %1051 = vmatprep.subr.bf16.mxu0 %v1174_v0  ;;  %1072 = vmatpush3.bf16.msra.mxu1 %v1173_v63 }
  0x56   :  { %1073 = vmatprep.subr.bf16.mxu1 %v1175_v1 }
  0x58   :  { %1052 = vmatpush3.bf16.msra.mxu0 %v1176_v2 }
  0x59   :  { %1053 = vmatprep.subr.bf16.mxu0 %v1178_v4  ;;  %1074 = vmatpush3.bf16.msra.mxu1 %v1177_v3 }
  0x5a   :  { %1075 = vmatprep.subr.bf16.mxu1 %v1179_v5 }
  0x5c   :  { %1054 = vmatpush3.bf16.msra.mxu0 %v1180_v6 }
  0x5d   :  { %1055 = vmatprep.subr.bf16.mxu0 %v1182_v8  ;;  %1076 = vmatpush3.bf16.msra.mxu1 %v1181_v7 }
  0x5e   :  { %1077 = vmatprep.subr.bf16.mxu1 %v1183_v9 }
  0x60   :  { %1056 = vmatpush3.bf16.msra.mxu0 %v1184_v10 }
  0x61   :  { %1057 = vmatprep.subr.bf16.mxu0 %v1186_v12  ;;  %1078 = vmatpush3.bf16.msra.mxu1 %v1185_v11 }
  0x62   :  { %1079 = vmatprep.subr.bf16.mxu1 %v1187_v13 }
  0x64   :  { %1058 = vmatpush3.bf16.msra.mxu0 %v1188_v14 }
  0x65   :  { %1080 = vmatpush3.bf16.msra.mxu1 %v1189_v16  ;;  %1096 = vmatprep.subr.bf16.mxu0 %v1291_v27 }
  0x67   :  { %747 = vmatmul.mubr.bf16.vlgmr.msra.gmra.mxu0 %v111_v21 }
  0x68   :  { %787 = vmatmul.mubr.bf16.vlgmr.msra.gmra.mxu1 %v113_v24  ;;  %1097 = vmatpush3.bf16.msra.mxu0 %v1191_v26 }
  0x69   :  { %1098 = vmatprep.subr.bf16.mxu0 %v1291_v27  ;;  %1112 = vmatprep.mubr.msk.bf16.mxu0 %vm1292_vm0, %v1291_v27 }
  0x6c   :  { %1099 = vmatpush3.bf16.msra.mxu0 %v1192_v28 }
  0x6d   :  { %1100 = vmatprep.subr.bf16.mxu0 %v1291_v27 }
  0x70   :  { %1101 = vmatpush3.bf16.msra.mxu0 %v1193_v29 }
  0x71   :  { %1102 = vmatprep.subr.bf16.mxu0 %v1291_v27 }
  0x74   :  { %1103 = vmatpush3.bf16.msra.mxu0 %v1194_v30 }
  0x75   :  { %1104 = vmatprep.subr.bf16.mxu0 %v1291_v27 }
  0x78   :  { %1105 = vmatpush3.bf16.msra.mxu0 %v1195_v31 }
  0x79   :  { %1106 = vmatprep.subr.bf16.mxu0 %v1291_v27 }
  0x7c   :  { %1107 = vmatpush3.bf16.msra.mxu0 %v1196_v32 }
  0x7d   :  { %1108 = vmatprep.subr.bf16.mxu0 %v1291_v27 }
  0x80   :  { %1109 = vmatpush3.bf16.msra.mxu0 %v1197_v33 }
  0x81   :  { %1110 = vmatprep.subr.bf16.mxu0 %v1291_v27 }
  0x84   :  { %1111 = vmatpush3.bf16.msra.mxu0 %v1198_v34 }
 0x107   :  { %v1015_v35 = vpop.f32.mrf.mxu0 }
 0x108   :  { %v1037_v36 = vpop.f32.mrf.mxu1 }
 0x109   :  { %v1016_v37 = vpop.f32.mrf.mxu0 }
 0x10a   :  { %v1038_v38 = vpop.f32.mrf.mxu1  ;;  %v1017_v43 = vadd.f32 %v1016_v37, %v1015_v35 }
 0x10b   :  { %v1018_v39 = vpop.f32.mrf.mxu0  ;;  %v1039_v46 = vadd.f32 %v1038_v38, %v1037_v36 }
 0x10c   :  { %v1040_v40 = vpop.f32.mrf.mxu1  ;;  %v669_v45 = vadd.f32 %v1017_v43, %v925_v44 }
 0x10d   :  { %v1019_v41 = vpop.f32.mrf.mxu0 }
 0x10e   :  { %v1041_v42 = vpop.f32.mrf.mxu1  ;;  %v709_v50 = vadd.f32 %v1039_v46, %v669_v45 }
 0x127   :  { %v1059_v47 = vpop.f32.mrf.mxu0 }
 0x128   :  { %v1081_v48 = vpop.f32.mrf.mxu1 }
 0x129   :  { %v1060_v49 = vpop.f32.mrf.mxu0 }
 0x12a   :  { %v1061_v51 = vadd.f32 %v1060_v49, %v1059_v47  ;;  %v1082_v52 = vpop.f32.mrf.mxu1 }
 0x12b   :  { %v1062_v53 = vpop.f32.mrf.mxu0  ;;  %v1083_v55 = vadd.f32 %v1082_v52, %v1081_v48 }
 0x12c   :  { %v749_v54 = vadd.f32 %v1061_v51, %v709_v50  ;;  %v1084_v56 = vpop.f32.mrf.mxu1 }
 0x12d   :  { %v1063_v57 = vpop.f32.mrf.mxu0 }
 0x12e   :  { %v789_v58 = vadd.f32 %v1083_v55, %v749_v54  ;;  %v1085_v59 = vpop.f32.mrf.mxu1 }
 0x130   :  { %v794_v60 = vmax.f32 %v789_v58, 0.0 }
 0x132   :  { %v795_v61 = vpack.c.bf16 %v794_v60, %v794_v60 }
 0x134   :  { %1113 = vmatmul.mubr.bf16.vlgmr.msra.gmra.mxu0 %v795_v61 }
 0x1f4   :  { %v901_v63 = vpop.f32.mrf.mxu0 }
 0x1f5   :  { %v902_v0 = vadd.f32 %v990_v62, %v901_v63 }
 0x1f6   :  { %v1114_v1 = vpop.f32.mrf.mxu0 }
 0x1f7   :  { %v907_v2 = vpack.c.bf16 %v902_v0, %v902_v0 }
 0x1f8   :  { %v904_v3 = vpop.f32.mrf.mxu0 }
 0x1f9   :  { %908 = vst [vmem:[#allocation8] sm:$0x1] %v907_v2 }
 0x1fa   :  { %v1115_v4 = vpop.f32.mrf.mxu0 }
 0x1fb   :  { %1270 = shalt.err (!%p1267_p5)
}
 0x1fc   :  { %918 = dma.vmem_to_hbm [thread:$0]  %s916_s11, 16, %s1353_s5, [#allocation4]  }
 0x1fd   :  { %1283 = dma.done.wait [#allocation4], 16  }
 0x1fe   :  { %1284 = vsyncadd [#allocation4], 4294967280 }
 0x1ff   :  { %922 = vsyncpa [#allocation3], 1 }
 0x200   :  { %923 = vsyncpa [#allocation6], 1 }
 0x201   :  { %924 = vsyncpa [#allocation4], 1 }

</bundles_post_ra>
